<compile_context>
chip_gen: v7x
topology: tpu7x:2x2x1
jax: 0.10.0
libtpu: 0.0.40
codegen_flags: <defaults>
</compile_context>

<pallas_src>
import functools

import jax
import jax.numpy as jnp
from jax.experimental import pallas as pl
from jax.experimental.pallas import tpu as pltpu


def nce_loss_kernel(x1_ref, x2_ref, rhs_ref, out_ref, *, inv_temp, tile_rows):
    """One grid step: per-sample NCE loss for rows [i*tile_rows, (i+1)*tile_rows)."""
    i = pl.program_id(0)
    B, D = x1_ref.shape
    tm = tile_rows
    row0 = pl.multiple_of(i * tm, tm)

    x1_t = x1_ref[pl.ds(row0, tm), :]          # (tm, D)
    x2_t = x2_ref[pl.ds(row0, tm), :]          # (tm, D)
    rhs = rhs_ref[...]                         # (D, 2B) = [x1.T | x2.T], resident

    # Fused similarity rows (columns 0..B-1 vs x1, columns B..2B-1 vs x2).
    s1 = jnp.dot(x1_t, rhs, preferred_element_type=jnp.float32) * inv_temp  # [sim11 | sim12]
    s2 = jnp.dot(x2_t, rhs, preferred_element_type=jnp.float32) * inv_temp  # [sim12.T | sim22]

    # Mask self-similarity diagonals: sim11[i,i] and sim22[i,i] -> -inf.
    r_iota = jax.lax.broadcasted_iota(jnp.int32, (tm, 2 * B), 0)
    c_iota = jax.lax.broadcasted_iota(jnp.int32, (tm, 2 * B), 1)
    g = r_iota + row0                                     # global sample index per row
    s1 = jnp.where(c_iota == g, -jnp.inf, s1)             # sim11 diagonal
    s2 = jnp.where(c_iota == g + B, -jnp.inf, s2)         # sim22 diagonal

    # Positive logit for both CE rows of sample g: sim12[g, g] = x1[g]·x2[g] / t.
    pos = jnp.sum(x1_t.astype(jnp.float32) * x2_t.astype(jnp.float32),
                  axis=-1, keepdims=True) * inv_temp      # (tm, 1)

    def row_lse(s):                                       # stable logsumexp over lanes
        m = jnp.max(s, axis=-1, keepdims=True)
        return m + jnp.log(jnp.sum(jnp.exp(s - m), axis=-1, keepdims=True))

    # CE row g:    lse([sim12[g], sim11[g]])   - pos  == row_lse(s1) - pos
    # CE row B+g:  lse([sim22[g], sim12.T[g]]) - pos  == row_lse(s2) - pos
    out_ref[...] = ((row_lse(s1) - pos) + (row_lse(s2) - pos)).astype(out_ref.dtype)


def nce_loss(batch_sample_one, batch_sample_two, temperature, tile_rows=None):
    x1, x2 = batch_sample_one, batch_sample_two
    B, D = x1.shape
    if tile_rows is None:
        tile_rows = B if B <= 128 else 128
    assert B % tile_rows == 0, "batch must be divisible by tile_rows (or pass tile_rows=B)"
    num_tiles = B // tile_rows

    # Shared RHS for every similarity matmul, transposed once on the host side.
    rhs = jnp.concatenate([x1, x2], axis=0).T             # (D, 2B)

    kernel = functools.partial(
        nce_loss_kernel, inv_temp=1.0 / float(temperature), tile_rows=tile_rows)

    per_sample = pl.pallas_call(
        kernel,
        out_shape=jax.ShapeDtypeStruct((B, 1), jnp.float32),
        grid=(num_tiles,),
        in_specs=[
            pl.BlockSpec((B, D), lambda i: (0, 0)),       # x1, resident in VMEM
            pl.BlockSpec((B, D), lambda i: (0, 0)),       # x2, resident in VMEM
            pl.BlockSpec((D, 2 * B), lambda i: (0, 0)),   # [x1|x2].T, resident in VMEM
        ],
        out_specs=pl.BlockSpec((tile_rows, 1), lambda i: (i, 0)),
        compiler_params=pltpu.CompilerParams(
            dimension_semantics=("parallel",)),
        cost_estimate=pl.CostEstimate(
            flops=8 * B * B * D,                          # 2 matmuls/tile, (tm,D)x(D,2B)
            transcendentals=4 * B * B + 2 * B,            # exps + logs
            bytes_accessed=(4 * B * D + B) * 4,
        ),
    )(x1, x2, rhs)

    # CrossEntropy mean over the 2B logit rows (each per_sample entry already
    # combines the two CE rows belonging to one sample).
    return jnp.sum(per_sample) / (2.0 * B)


def nce_loss_ref(x1, x2, temperature):
    """Pure-JAX reference mirroring the PyTorch forward line-by-line."""
    sim11 = x1 @ x1.T / temperature
    sim22 = x2 @ x2.T / temperature
    sim12 = x1 @ x2.T / temperature
    d = sim12.shape[-1]
    idx = jnp.arange(d)
    sim11 = sim11.at[idx, idx].set(-jnp.inf)
    sim22 = sim22.at[idx, idx].set(-jnp.inf)
    raw1 = jnp.concatenate([sim12, sim11], axis=-1)
    raw2 = jnp.concatenate([sim22, sim12.T], axis=-1)
    logits = jnp.concatenate([raw1, raw2], axis=-2)       # (2d, 2d)
    labels = jnp.arange(2 * d)
    lse = jax.scipy.special.logsumexp(logits, axis=-1)
    return jnp.mean(lse - logits[labels, labels])


if __name__ == "__main__":
    batch, hidden = 16, 32
    temperature = 1.0

    key = jax.random.PRNGKey(0)
    k1, k2 = jax.random.split(key)
    batch_sample_one = jax.random.normal(k1, (batch, hidden), jnp.float32)
    batch_sample_two = jax.random.normal(k2, (batch, hidden), jnp.float32)

    # tile_rows=8 -> grid of 2 steps, exercising the tiled/parallel path.
    loss = nce_loss(batch_sample_one, batch_sample_two, temperature, tile_rows=8)
    loss = jax.block_until_ready(loss)

    ref = nce_loss_ref(batch_sample_one, batch_sample_two, temperature)
    assert loss.shape == ()
    assert bool(jnp.isfinite(loss))
    assert jnp.allclose(loss, ref, atol=1e-4, rtol=1e-4), (loss, ref)

    print("KERNEL_OK")
</pallas_src>

<mosaic_0001>
module attributes {stable_mosaic.version = 11 : i64} {
  func.func @nce_loss_kernel(%arg0: i32, %arg1: memref<16x32xf32, #tpu.memory_space<vmem>>, %arg2: memref<16x32xf32, #tpu.memory_space<vmem>>, %arg3: memref<32x32xf32, #tpu.memory_space<vmem>>, %arg4: memref<8x1xf32, #tpu.memory_space<vmem>>) attributes {dimension_semantics = [#tpu.dimension_semantics<parallel>], iteration_bounds = array<i64: 2>, scalar_prefetch = 0 : i64, scratch_operands = 0 : i64, tpu.core_type = #tpu.core_type<tc>, window_params = [{pipeline_mode = #tpu.pipeline_mode<synchronous>, transform_indices = @transform_0, window_bounds = array<i64: 16, 32>}, {pipeline_mode = #tpu.pipeline_mode<synchronous>, transform_indices = @transform_1, window_bounds = array<i64: 16, 32>}, {pipeline_mode = #tpu.pipeline_mode<synchronous>, transform_indices = @transform_2, window_bounds = array<i64: 32, 32>}, {transform_indices = @transform_3, window_bounds = array<i64: 8, 1>}]} {
    %c8_i32 = arith.constant 8 : i32
    %0 = arith.muli %arg0, %c8_i32 : i32
    %1 = tpu.assume_multiple %0, 8 : i32
    %2 = arith.index_cast %1 : i32 to index
    %c0 = arith.constant 0 : index
    %3 = vector.load %arg1[%2, %c0] : memref<16x32xf32, #tpu.memory_space<vmem>>, vector<8x32xf32>
    %4 = arith.index_cast %1 : i32 to index
    %c0_0 = arith.constant 0 : index
    %5 = vector.load %arg2[%4, %c0_0] : memref<16x32xf32, #tpu.memory_space<vmem>>, vector<8x32xf32>
    %c0_1 = arith.constant 0 : index
    %c0_2 = arith.constant 0 : index
    %6 = vector.load %arg3[%c0_1, %c0_2] : memref<32x32xf32, #tpu.memory_space<vmem>>, vector<32x32xf32>
    %cst = arith.constant dense<0.000000e+00> : vector<8x32xf32>
    %7 = tpu.matmul %3, %6, %cst {dimension_numbers = #tpu.dot_dimension_numbers<[1], [0], [0], [1], [0, 0, 1, 1], [], []>} : vector<8x32xf32>, vector<32x32xf32>, vector<8x32xf32> -> vector<8x32xf32>
    %cst_3 = arith.constant 1.000000e+00 : f32
    %8 = vector.broadcast %cst_3 : f32 to vector<8x32xf32>
    %9 = arith.mulf %7, %8 : vector<8x32xf32>
    %cst_4 = arith.constant dense<0.000000e+00> : vector<8x32xf32>
    %10 = tpu.matmul %5, %6, %cst_4 {dimension_numbers = #tpu.dot_dimension_numbers<[1], [0], [0], [1], [0, 0, 1, 1], [], []>} : vector<8x32xf32>, vector<32x32xf32>, vector<8x32xf32> -> vector<8x32xf32>
    %cst_5 = arith.constant 1.000000e+00 : f32
    %11 = vector.broadcast %cst_5 : f32 to vector<8x32xf32>
    %12 = arith.mulf %10, %11 : vector<8x32xf32>
    %13 = tpu.iota {dimensions = array<i32: 0>} : vector<8x32xi32>
    %14 = tpu.iota {dimensions = array<i32: 1>} : vector<8x32xi32>
    %15 = vector.broadcast %1 : i32 to vector<8x32xi32>
    %16 = arith.addi %13, %15 : vector<8x32xi32>
    %17 = arith.cmpi eq, %14, %16 : vector<8x32xi32>
    %cst_6 = arith.constant 0xFF800000 : f32
    %18 = vector.broadcast %cst_6 : f32 to vector<8x32xf32>
    %19 = arith.select %17, %18, %9 : vector<8x32xi1>, vector<8x32xf32>
    %c16_i32 = arith.constant 16 : i32
    %20 = vector.broadcast %c16_i32 : i32 to vector<8x32xi32>
    %21 = arith.addi %16, %20 : vector<8x32xi32>
    %22 = arith.cmpi eq, %14, %21 : vector<8x32xi32>
    %cst_7 = arith.constant 0xFF800000 : f32
    %23 = vector.broadcast %cst_7 : f32 to vector<8x32xf32>
    %24 = arith.select %22, %23, %12 : vector<8x32xi1>, vector<8x32xf32>
    %25 = arith.mulf %3, %5 : vector<8x32xf32>
    %cst_8 = arith.constant dense<0.000000e+00> : vector<8xf32>
    %26 = vector.multi_reduction <add>, %25, %cst_8 [1] : vector<8x32xf32> to vector<8xf32>
    %27 = vector.shape_cast %26 : vector<8xf32> to vector<8x1xf32>
    %cst_9 = arith.constant 1.000000e+00 : f32
    %28 = vector.broadcast %cst_9 : f32 to vector<8x1xf32>
    %29 = arith.mulf %27, %28 : vector<8x1xf32>
    %cst_10 = arith.constant dense<0xFF800000> : vector<8xf32>
    %30 = vector.multi_reduction <maximumf>, %19, %cst_10 [1] : vector<8x32xf32> to vector<8xf32>
    %31 = vector.shape_cast %30 : vector<8xf32> to vector<8x1xf32>
    %32 = vector.broadcast %31 : vector<8x1xf32> to vector<8x32xf32>
    %33 = arith.subf %19, %32 : vector<8x32xf32>
    %34 = math.exp %33 : vector<8x32xf32>
    %cst_11 = arith.constant dense<0.000000e+00> : vector<8xf32>
    %35 = vector.multi_reduction <add>, %34, %cst_11 [1] : vector<8x32xf32> to vector<8xf32>
    %36 = vector.shape_cast %35 : vector<8xf32> to vector<8x1xf32>
    %37 = math.log %36 : vector<8x1xf32>
    %38 = arith.addf %31, %37 : vector<8x1xf32>
    %39 = arith.subf %38, %29 : vector<8x1xf32>
    %cst_12 = arith.constant dense<0xFF800000> : vector<8xf32>
    %40 = vector.multi_reduction <maximumf>, %24, %cst_12 [1] : vector<8x32xf32> to vector<8xf32>
    %41 = vector.shape_cast %40 : vector<8xf32> to vector<8x1xf32>
    %42 = vector.broadcast %41 : vector<8x1xf32> to vector<8x32xf32>
    %43 = arith.subf %24, %42 : vector<8x32xf32>
    %44 = math.exp %43 : vector<8x32xf32>
    %cst_13 = arith.constant dense<0.000000e+00> : vector<8xf32>
    %45 = vector.multi_reduction <add>, %44, %cst_13 [1] : vector<8x32xf32> to vector<8xf32>
    %46 = vector.shape_cast %45 : vector<8xf32> to vector<8x1xf32>
    %47 = math.log %46 : vector<8x1xf32>
    %48 = arith.addf %41, %47 : vector<8x1xf32>
    %49 = arith.subf %48, %29 : vector<8x1xf32>
    %50 = arith.addf %39, %49 : vector<8x1xf32>
    %c0_14 = arith.constant 0 : index
    %c0_15 = arith.constant 0 : index
    %51 = vector.load %arg4[%c0_14, %c0_15] : memref<8x1xf32, #tpu.memory_space<vmem>>, vector<8x1xf32>
    tpu.vector_store %arg4[%c0_14, %c0_15], %50 {strides = array<i32>} : memref<8x1xf32, #tpu.memory_space<vmem>>, vector<8x1xf32>,
    return
  }
  func.func @transform_0(%arg0: i32) -> (i32, i32) {
    %c0_i32 = arith.constant 0 : i32
    %c0_i32_0 = arith.constant 0 : i32
    %c0_i32_1 = arith.constant 0 : i32
    return %c0_i32, %c0_i32_0 : i32, i32
  }
  func.func @transform_1(%arg0: i32) -> (i32, i32) {
    %c0_i32 = arith.constant 0 : i32
    %c0_i32_0 = arith.constant 0 : i32
    %c0_i32_1 = arith.constant 0 : i32
    return %c0_i32, %c0_i32_0 : i32, i32
  }
  func.func @transform_2(%arg0: i32) -> (i32, i32) {
    %c0_i32 = arith.constant 0 : i32
    %c0_i32_0 = arith.constant 0 : i32
    %c0_i32_1 = arith.constant 0 : i32
    return %c0_i32, %c0_i32_0 : i32, i32
  }
  func.func @transform_3(%arg0: i32) -> (i32, i32) {
    %c0_i32 = arith.constant 0 : i32
    %c0_i32_0 = arith.constant 0 : i32
    return %arg0, %c0_i32 : i32, i32
  }
}

</mosaic_0001>

<bundles_post_ra>
// kernel: tpu_custom_call.1
= control target key start
LH: loop header
LB: loop body
LE: loop exit
PB: predicated region body
PF: predicated region fallthrough
CT: control target
= control target key end

     0   :  { %8 = vsyncpa [#allocation3], 0  ;;  %s841_s0 = inlined_call_operand.hbm [shape: f32[16,32], index: 0, kind: input, shape index: {}]   ;;  %s842_s1 = inlined_call_operand.hbm [shape: f32[16,32], index: 1, kind: input, shape index: {}]   ;;  %s843_s2 = inlined_call_operand.hbm [shape: f32[32,32], index: 2, kind: input, shape index: {}]   ;;  %s844_s3 = inlined_call_operand.vmem [shape: f32[16,1], index: 3, kind: output, shape index: {}]  }
   0x1   :  { %9 = vsyncpa [#allocation5], 0  ;;  %s709_s12 = smov 0  }
   0x2 LB: > { %s715_s13 = sadd.s32 4294967295, %s679_s12   ;;  %p471_p0 = scmp.ge.s32.totalorder %s679_s12, 1  ;;  %s679_s12 = sphi %s709_s12, %s15_s12  }
   0x3   : > { %p109_p1 = scmp.lt.s32.totalorder %s679_s12, 3  ;;  %p845_p2 = scmp.eq.s32.totalorder %s715_s13, 0 }
   0x4   : > { %s681_s15 = smov [#allocation4]   ;;  %s682_s17 = smov [#allocation2]  }
   0x5   : > { %p720_p3 = pnand %p471_p0, %p109_p1  ;;  %s134_s16 = sshll.u32 %s681_s15, 4  ;;  %s135_s16 = int_to_ptr.vmem [resolvable:$true] %s134_s16 }
   0x6   : > { %s121_s18 = sshll.u32 %s682_s17, 4  ;;  %s683_s20 = smov [#allocation6]   ;;  %s732_s18 = int_to_ptr.vmem [resolvable:$true] %s121_s18 }
   0x7   : > { %s847_s14 = scalar_select %p720_p3, 1, 0 }
   0x8   : > { %p541_p4 = pneg %p720_p3  ;;  %s147_s21 = sshll.u32 %s683_s20, 4  ;;  %s734_s21 = int_to_ptr.vmem [resolvable:$true] %s147_s21 }
   0x9   : > { %s581_s24 = scalar_lea.hbm %s842_s1, 256 }
   0xa   : > { %p728_p5 = pnand %p845_p2, %p541_p4  ;;  %p582_p6 = scmp.ne.s32.totalorder %s842_s1, %s581_s24 }
   0xb   : > { %p588_p10 = scmp.lt.u32.totalorder %s581_s24, %s842_s1 }
   0xc   : > { %p744_p7 = pneg %p728_p5 }
   0xe   : > { %p584_p8 = pnand %p744_p7, %p582_p6 }
  0x10   : > { %p585_p9 = pneg %p584_p8 }
  0x12   : > { %p590_p11 = pnand %p588_p10, %p585_p9 }
  0x14   : > { %593 = shalt.err (!%p590_p11)
}
  0x15   : > { %s594_s30 = scalar_lea.vmem %s135_s16, 256  ;;  %p602_p1 = scmp.lt.s32.totalorder %s135_s16, %s135_s16 }
  0x16   : > { %p595_p12 = scmp.ne.s32.totalorder %s135_s16, %s594_s30  ;;  %p603_p4 = scmp.lt.s32.totalorder %s594_s30, %s594_s30 }
  0x18   : > { %p597_p13 = pnand %p595_p12, %p744_p7  ;;  %p604_p2 = por %p603_p4, %p602_p1 }
  0x1a   : > { %p598_p0 = pneg %p597_p13 }
  0x1c   : > { %p605_p3 = pnand %p604_p2, %p598_p0 }
  0x1e   : > { %608 = shalt.err (!%p605_p3)
}
  0x1f   : > { %s684_s4 = smov 128   ;;  %s685_s5 = smov 8  }
  0x20   : > { %547 = dma.hbm_to_vmem [thread:$0]  (!%p728_p5), %s842_s1, 256, %s135_s16, [#allocation5], %s684_s4, %s684_s4, %s685_s5  }
  0x21   : > { %s609_s10 = scalar_lea.hbm %s841_s0, 256 }
  0x22   : > { %p610_p2 = scmp.ne.s32.totalorder %s841_s0, %s609_s10  ;;  %p616_p8 = scmp.lt.u32.totalorder %s609_s10, %s841_s0 }
  0x24   : > { %p612_p3 = pnand %p610_p2, %p744_p7 }
  0x26   : > { %p613_p6 = pneg %p612_p3 }
  0x28   : > { %p618_p9 = pnand %p616_p8, %p613_p6 }
  0x2a   : > { %621 = shalt.err (!%p618_p9)
}
  0x2b   : > { %s622_s16 = scalar_lea.vmem %s732_s18, 256  ;;  %p630_p13 = scmp.lt.s32.totalorder %s732_s18, %s732_s18 }
  0x2c   : > { %p623_p10 = scmp.ne.s32.totalorder %s732_s18, %s622_s16  ;;  %p631_p0 = scmp.lt.s32.totalorder %s622_s16, %s622_s16 }
  0x2e   : > { %p625_p11 = pnand %p623_p10, %p744_p7  ;;  %p632_p1 = por %p631_p0, %p630_p13 }
  0x30   : > { %p626_p12 = pneg %p625_p11 }
  0x32   : > { %p633_p4 = pnand %p632_p1, %p626_p12 }
  0x34   : > { %636 = shalt.err (!%p633_p4)
}
  0x35   : > { %544 = dma.hbm_to_vmem [thread:$0]  (!%p728_p5), %s841_s0, 256, %s732_s18, [#allocation3], %s684_s4, %s684_s4, %s685_s5  }
  0x36   : > { %s637_s26 = scalar_lea.hbm %s843_s2, 512 }
  0x37   : > { %p638_p2 = scmp.ne.s32.totalorder %s843_s2, %s637_s26  ;;  %p644_p8 = scmp.lt.u32.totalorder %s637_s26, %s843_s2 }
  0x39   : > { %p640_p3 = pnand %p638_p2, %p744_p7 }
  0x3b   : > { %p641_p6 = pneg %p640_p3 }
  0x3d   : > { %p646_p9 = pnand %p644_p8, %p641_p6 }
  0x3f   : > { %649 = shalt.err (!%p646_p9)
}
  0x40   : > { %s650_s18 = scalar_lea.vmem %s734_s21, 512  ;;  %p658_p13 = scmp.lt.s32.totalorder %s734_s21, %s734_s21 }
  0x41   : > { %p651_p10 = scmp.ne.s32.totalorder %s734_s21, %s650_s18  ;;  %p659_p0 = scmp.lt.s32.totalorder %s650_s18, %s650_s18 }
  0x43   : > { %p653_p11 = pnand %p651_p10, %p744_p7  ;;  %p660_p1 = por %p659_p0, %p658_p13 }
  0x45   : > { %p654_p12 = pneg %p653_p11 }
  0x47   : > { %p661_p4 = pnand %p660_p1, %p654_p12 }
  0x49   : > { %664 = shalt.err (!%p661_p4)
}
  0x4a   : > { %550 = dma.hbm_to_vmem [thread:$0]  (!%p728_p5), %s843_s2, 512, %s734_s21, [#allocation5], %s684_s4, %s684_s4, %s685_s5  }
  0x4b   : > { %p850_p2 = scmp.ne.s32.totalorder %s847_s14, 0 }
  0x4c   : > { %p851_p7 = scmp.eq.s32.totalorder (!%p850_p2), %s715_s13, 0 }
  0x4d   : > { %163 = sbr.rel (%p850_p2) target bundleno = 638 (0x27e), region = 32 }
  0x54   : > { %670 = dma.done.wait (%p851_p7), [#allocation3], 256   ;;  %p852_p3 = pmov %p851_p7 }
  0x56   : > { %672 = vsyncadd (%p852_p3), [#allocation3], 4294967040  ;;  %p853_p6 = pmov %p852_p3 }
  0x57   : > { %p854_p8 = pmov %p852_p3 }
  0x58   : > { %674 = dma.done.wait (%p853_p6), [#allocation5], 768  }
  0x59   : > { %676 = vsyncadd (%p854_p8), [#allocation5], 4294966528  ;;  %v686_v0 = vmov 0.0|0.0   ;;  %vm687_vm0 = vmmov 0   ;;  %v688_v1 = vmov 0.0   ;;  %v198_v2 = vld [vmem:[#allocation6] sm:$0xff]  ;;  %v349_v10 = vlaneseq }
  0x5a   : > { %517 = vmatprep.subr.bf16.mxu0 %v686_v0  ;;  %523 = vmatprep.subr.bf16.mxu1 %v686_v0  ;;  %v199_v3 = vld [vmem:[#allocation6 + $0x8] sm:$0xff]  ;;  %v200_v4 = vld [vmem:[#allocation6 + $0x10] sm:$0xff]  ;;  %v201_v6 = vld [vmem:[#allocation6 + $0x18] sm:$0xff]  ;;  %s480_s14 = sshll.u32 %s715_s13, 3  ;;  %vm202_vm1 = vcmask 261120   ;;  %p189_p5 = scmp.lt.s32.totalorder %s715_s13, 1 }
  0x5b   : > { %503 = vmatprep.mubr.msk.f32.mxu0 %vm687_vm0, %v688_v1  ;;  %514 = vmatprep.mubr.msk.f32.mxu1 %vm687_vm0, %v688_v1  ;;  %v518_v5 = vpack.c.bf16 %v199_v3, %v198_v2  ;;  %v521_v7 = vpack.c.bf16 %v201_v6, %v200_v4  ;;  %s194_s19 = scalar_lea.vmem [#allocation2], %s480_s14  ;;  %s196_s21 = scalar_lea.vmem [#allocation4], %s480_s14  ;;  %v350_v11 = vshrl.u32 %v349_v10, 7  ;;  %v353_v12 = vstv %s480_s14 }
  0x5c   : > { %v195_v8 = vld [vmem:[%s194_s19] sm:$0xff]  ;;  %v352_v14 = vand.u32 127, %v349_v10  ;;  %s856_s13 = smov (!%p189_p5, %s715_s13), 1  ;;  %vm391_vm4 = vcmask 7168  }
  0x5d   : > { %519 = vmatpush3.bf16.msra.mxu0 %v518_v5  ;;  %525 = vmatpush3.bf16.msra.mxu1 %v518_v5  ;;  %v197_v9 = vld [vmem:[%s196_s21] sm:$0xff]  ;;  %v354_v13 = vadd.s32 %v353_v12, %v350_v11  ;;  %s479_s27 = sshll.u32 %s856_s13, 3 }
  0x5e   : > { %520 = vmatprep.subr.bf16.mxu0 %v686_v0  ;;  %526 = vmatprep.subr.bf16.mxu1 %v686_v0  ;;  %v360_v24 = vmul.f32 %v197_v9, %v195_v8  ;;  %s192_s9 = scalar_lea.vmem %s844_s3, %s479_s27 }
  0x5f   : > { %v357_v15 = vadd.s32 16, %v354_v13  ;;  %vm355_vm2 = vcmp.eq.s32.totalorder %v352_v14, %v354_v13 }
  0x60   : > { %v361_v25 = vsel %vm202_vm1, %v360_v24, 0.0 }
  0x61   : > { %522 = vmatpush3.bf16.msra.mxu0 %v521_v7  ;;  %528 = vmatpush3.bf16.msra.mxu1 %v521_v7  ;;  %vm358_vm3 = vcmp.eq.s32.totalorder %v352_v14, %v357_v15 }
  0x64   : > { %504 = vmatmul.mubr.msk.f32.vlgmr.msra.gmra.mrb[0].mxu0 %vm202_vm1, %v195_v8  ;;  %515 = vmatmul.mubr.msk.f32.vlgmr.msra.gmra.mrb[0].mxu1 %vm202_vm1, %v197_v9 }
 0x137   : > { %v272_v16 = vpop.f32.mrb[0].mxu0  ;;  %v345_v17 = vpop.f32.mrb[0].mxu1 }
 0x138   : > { %v356_v18 = vsel %vm355_vm2, -inf, %v272_v16  ;;  %v505_v19 = vpop.f32.mrb[1].mxu0  ;;  %v359_v20 = vsel %vm358_vm3, -inf, %v345_v17  ;;  %v516_v21 = vpop.f32.mrb[1].mxu1 }
 0x139   : > { %v364_v22 = vsel %vm202_vm1, %v356_v18, -inf  ;;  %v377_v23 = vsel %vm202_vm1, %v359_v20, -inf }
 0x13a   : > { %365 = vmax.xlane.f32.xlu0 %v364_v22 }
 0x13e   : > { %378 = vmax.xlane.f32.xlu0 %v377_v23 }
 0x142   : > { %362 = vadd.xlane.f32.xlu0 %v361_v25 }
 0x1c7   : > { %v366_v26 = vpop.xlane.xlu0 %365 }
 0x1c8   : > { %v367_v27 = vsub.f32 %v356_v18, %v366_v26 }
 0x1ca   : > { %v368_v28 = vmul.f32 1.442695, %v367_v27 }
 0x1cb   : > { %v379_v29 = vpop.xlane.xlu0 %378 }
 0x1cc   : > { %573 = vpow2.f32 %v368_v28  ;;  %v380_v30 = vsub.f32 %v359_v20, %v379_v29 }
 0x1ce   : > { %v381_v31 = vmul.f32 1.442695, %v380_v30 }
 0x1cf   : > { %v363_v43 = vpop.xlane.xlu0 %362 }
 0x1d0   : > { %575 = vpow2.f32 %v381_v31 }
 0x1d6   : > { %v574_v32 = vpop.eup %573 }
 0x1d7   : > { %v370_v33 = vsel %vm202_vm1, %v574_v32, 0.0 }
 0x1d8   : > { %371 = vadd.xlane.f32.xlu1 %v370_v33 }
 0x1da   : > { %v576_v34 = vpop.eup %575 }
 0x1db   : > { %v383_v35 = vsel %vm202_vm1, %v576_v34, 0.0 }
 0x1dc   : > { %384 = vadd.xlane.f32.xlu1 %v383_v35 }
 0x265   : > { %v372_v36 = vpop.xlane.xlu1 %371 }
 0x266   : > { %577 = vlog2.f32 %v372_v36 }
 0x269   : > { %v385_v37 = vpop.xlane.xlu1 %384 }
 0x26a   : > { %579 = vlog2.f32 %v385_v37 }
 0x270   : > { %v578_v38 = vpop.eup %577 }
 0x271   : > { %v374_v39 = vmul.f32 0.6931472, %v578_v38 }
 0x273   : > { %v375_v42 = vadd.f32 %v374_v39, %v366_v26 }
 0x274   : > { %v580_v40 = vpop.eup %579 }
 0x275   : > { %v387_v41 = vmul.f32 0.6931472, %v580_v40  ;;  %v376_v45 = vsub.f32 %v375_v42, %v363_v43 }
 0x277   : > { %v388_v44 = vadd.f32 %v387_v41, %v379_v29 }
 0x279   : > { %v389_v46 = vsub.f32 %v388_v44, %v363_v43 }
 0x27b   : > { %v390_v47 = vadd.f32 %v389_v46, %v376_v45 }
 0x27d   : > { %392 = vst.msk [vmem:[%s192_s9] sm:$0xff] %vm391_vm4, %v390_v47 }
 0x27e PF: > { %s15_s12 = sadd.s32 1, %s679_s12  }
 0x27f   : > { %p12_p9 = scmp.ge.s32.totalorder %s15_s12, 4  }
 0x281   :  { %14 = sbr.rel (!%p12_p9) target bundleno = 2 (0x2), region = 74 }
 0x288   :  { %412 = vsyncpa [#allocation3], 1 }
 0x289   :  { %414 = vsyncpa [#allocation3 + $0x1], 1 }
 0x28a   :  { %415 = vsyncpa [#allocation5], 1 }

</bundles_post_ra>
